<compile_context>
chip_gen: v7x
topology: tpu7x:2x2x1
jax: 0.10.0
libtpu: 0.0.40
codegen_flags: <defaults>
</compile_context>

<pallas_src>
import jax
import jax.numpy as jnp
from jax.experimental import pallas as pl
from jax.experimental.pallas import tpu as pltpu

LANE = 128


def _round_up(x, m):
    return (x + m - 1) // m * m


def _mlp_kernel(x_ref, w1_ref, b1_ref, w2_ref, b2_ref, w3_ref, b3_ref, o_ref):
    # Three small MXU matmuls (f32 accumulate) + VPU bias/ReLU. Compute is tiny and
    # fully hidden under the x-read / logit-write DMA.
    x = x_ref[...]                                                     # (TB, D) f32
    h1 = jnp.dot(x, w1_ref[...], preferred_element_type=jnp.float32) + b1_ref[...]
    h1 = jnp.maximum(h1, 0.0)
    # Dropout(0.3): identity in inference mode.
    h2 = jnp.dot(h1, w2_ref[...], preferred_element_type=jnp.float32) + b2_ref[...]
    h2 = jnp.maximum(h2, 0.0)
    logits = jnp.dot(h2, w3_ref[...], preferred_element_type=jnp.float32) + b3_ref[...]
    # Lane-dense (TB, 128) bf16 store: unmasked full-vreg writeback, half the HBM
    # write bytes of f32. Lane padding is sliced away in the wrapper.
    o_ref[...] = logits.astype(o_ref.dtype)


def prepare_params(params):
    """Zero-pad weights/biases to 128-lane widths ONCE (hoisted out of per-call path).

    Weights stored (in, out) so the kernel computes x @ W + b directly. Zero-padded
    rows/cols and zero bias pads stay exactly zero through ReLU, so numerics match.
    """
    w1, b1 = params["w1"], params["b1"]
    w2, b2 = params["w2"], params["b2"]
    w3, b3 = params["w3"], params["b3"]
    D, H1 = w1.shape
    H2 = w2.shape[1]
    C = w3.shape[1]
    H1p, H2p, Cp = _round_up(H1, LANE), _round_up(H2, LANE), _round_up(C, LANE)
    f32 = jnp.float32
    w1p = jnp.zeros((D, H1p), f32).at[:, :H1].set(w1.astype(f32))
    w2p = jnp.zeros((H1p, H2p), f32).at[:H1, :H2].set(w2.astype(f32))
    w3p = jnp.zeros((H2p, Cp), f32).at[:H2, :C].set(w3.astype(f32))
    b1p = jnp.zeros((1, H1p), f32).at[:, :H1].set(b1.reshape(1, -1).astype(f32))
    b2p = jnp.zeros((1, H2p), f32).at[:, :H2].set(b2.reshape(1, -1).astype(f32))
    b3p = jnp.zeros((1, Cp), f32).at[:, :C].set(b3.reshape(1, -1).astype(f32))
    return dict(w1p=w1p, b1p=b1p, w2p=w2p, b2p=b2p, w3p=w3p, b3p=b3p, num_classes=C)


def clinical_mlp_forward(x, prepped, *, block_batch=2048):
    """x: (B, input_dim) float32. prepped: output of prepare_params. Returns (B, C) f32."""
    w1p, b1p = prepped["w1p"], prepped["b1p"]
    w2p, b2p = prepped["w2p"], prepped["b2p"]
    w3p, b3p = prepped["w3p"], prepped["b3p"]
    C = prepped["num_classes"]

    x = x.astype(jnp.float32)
    B, D = x.shape
    H1p, H2p, Cp = w1p.shape[1], w2p.shape[1], w3p.shape[1]

    # Batch tile: large enough to amortize per-grid-step overhead, capped so the grid
    # keeps >=2 steps when B allows (so the "parallel" axis shards across v7x's two
    # TensorCores), sublane-aligned. Ragged last block instead of padding x.
    TB = max(8, min(block_batch, _round_up(pl.cdiv(B, 2), 8)))
    grid = (pl.cdiv(B, TB),)

    # VMEM budget with lane-padded layouts: double-buffered streaming x/out tiles,
    # f32 intermediates, resident (double-counted for safety) weights, + headroom.
    lane_d = _round_up(D, LANE)
    tile_bytes = 2 * TB * (lane_d * 4 + Cp * 2) + 3 * TB * Cp * 4
    weight_bytes = 4 * (w1p.size + b1p.size + w2p.size + b2p.size + w3p.size + b3p.size)
    vmem_bytes = int(min(48 << 20, max(8 << 20, tile_bytes + 2 * weight_bytes + (2 << 20))))

    flops = 2 * B * (D * H1p + H1p * H2p + H2p * Cp)
    bytes_accessed = B * D * 4 + weight_bytes + B * Cp * 2

    out = pl.pallas_call(
        _mlp_kernel,
        out_shape=jax.ShapeDtypeStruct((B, Cp), jnp.bfloat16),
        grid=grid,
        in_specs=[
            pl.BlockSpec((TB, D), lambda i: (i, 0)),       # x tile streams per step
            pl.BlockSpec((D, H1p), lambda i: (0, 0)),      # weights / biases resident
            pl.BlockSpec((1, H1p), lambda i: (0, 0)),
            pl.BlockSpec((H1p, H2p), lambda i: (0, 0)),
            pl.BlockSpec((1, H2p), lambda i: (0, 0)),
            pl.BlockSpec((H2p, Cp), lambda i: (0, 0)),
            pl.BlockSpec((1, Cp), lambda i: (0, 0)),
        ],
        out_specs=pl.BlockSpec((TB, Cp), lambda i: (i, 0)),
        compiler_params=pltpu.CompilerParams(
            dimension_semantics=("parallel",),
            vmem_limit_bytes=vmem_bytes,
        ),
        cost_estimate=pl.CostEstimate(
            flops=flops, transcendentals=0, bytes_accessed=bytes_accessed),
    )(x, w1p, b1p, w2p, b2p, w3p, b3p)

    # Slice away lane padding -> true logits (f32 to match the PyTorch module output).
    return out[:, :C].astype(jnp.float32)


def init_params(key, input_dim, num_classes=2):
    """Mirrors PyTorch nn.Linear init (uniform +/- 1/sqrt(fan_in)), stored (in, out)."""
    k1, k2, k3, k4, k5, k6 = jax.random.split(key, 6)

    def lin(kw, kb, fan_in, fan_out):
        bound = 1.0 / jnp.sqrt(fan_in)
        w = jax.random.uniform(kw, (fan_in, fan_out), jnp.float32, -bound, bound)
        b = jax.random.uniform(kb, (1, fan_out), jnp.float32, -bound, bound)
        return w, b

    w1, b1 = lin(k1, k2, input_dim, 64)
    w2, b2 = lin(k3, k4, 64, 32)
    w3, b3 = lin(k5, k6, 32, num_classes)
    return {"w1": w1, "b1": b1, "w2": w2, "b2": b2, "w3": w3, "b3": b3}


def reference_forward(x, p):
    """Pure-JAX f32 reference (eval mode: dropout = identity)."""
    h1 = jnp.maximum(x @ p["w1"] + p["b1"], 0.0)
    h2 = jnp.maximum(h1 @ p["w2"] + p["b2"], 0.0)
    return h2 @ p["w3"] + p["b3"]


if __name__ == "__main__":
    key = jax.random.PRNGKey(0)
    kx, kp = jax.random.split(key)

    batch, input_dim, num_classes = 8, 16, 2
    x = jax.random.normal(kx, (batch, input_dim), jnp.float32)
    params = init_params(kp, input_dim, num_classes)
    prepped = prepare_params(params)   # one-time weight padding, reused across calls

    out = clinical_mlp_forward(x, prepped)
    out = jax.block_until_ready(out)

    ref = reference_forward(x, params)
    assert out.shape == (batch, num_classes), out.shape
    # Tolerance admits bf16 output rounding and TPU default matmul precision.
    assert jnp.allclose(out, ref, atol=2e-2, rtol=2e-2), "mismatch vs f32 JAX reference"

    print("KERNEL_OK")
</pallas_src>

<mosaic_0001>
module attributes {stable_mosaic.version = 11 : i64} {
  func.func @_mlp_kernel(%arg0: i32, %arg1: memref<8x16xf32, #tpu.memory_space<vmem>>, %arg2: memref<16x128xf32, #tpu.memory_space<vmem>>, %arg3: memref<1x128xf32, #tpu.memory_space<vmem>>, %arg4: memref<128x128xf32, #tpu.memory_space<vmem>>, %arg5: memref<1x128xf32, #tpu.memory_space<vmem>>, %arg6: memref<128x128xf32, #tpu.memory_space<vmem>>, %arg7: memref<1x128xf32, #tpu.memory_space<vmem>>, %arg8: memref<8x128xbf16, #tpu.memory_space<vmem>>) attributes {dimension_semantics = [#tpu.dimension_semantics<parallel>], iteration_bounds = array<i64: 1>, scalar_prefetch = 0 : i64, scratch_operands = 0 : i64, tpu.core_type = #tpu.core_type<tc>, window_params = [{transform_indices = @transform_0, window_bounds = array<i64: 8, 16>}, {pipeline_mode = #tpu.pipeline_mode<synchronous>, transform_indices = @transform_1, window_bounds = array<i64: 16, 128>}, {pipeline_mode = #tpu.pipeline_mode<synchronous>, transform_indices = @transform_2, window_bounds = array<i64: 1, 128>}, {pipeline_mode = #tpu.pipeline_mode<synchronous>, transform_indices = @transform_3, window_bounds = array<i64: 128, 128>}, {pipeline_mode = #tpu.pipeline_mode<synchronous>, transform_indices = @transform_4, window_bounds = array<i64: 1, 128>}, {pipeline_mode = #tpu.pipeline_mode<synchronous>, transform_indices = @transform_5, window_bounds = array<i64: 128, 128>}, {pipeline_mode = #tpu.pipeline_mode<synchronous>, transform_indices = @transform_6, window_bounds = array<i64: 1, 128>}, {transform_indices = @transform_7, window_bounds = array<i64: 8, 128>}]} {
    %c0 = arith.constant 0 : index
    %c0_0 = arith.constant 0 : index
    %0 = vector.load %arg1[%c0, %c0_0] : memref<8x16xf32, #tpu.memory_space<vmem>>, vector<8x16xf32>
    %c0_1 = arith.constant 0 : index
    %c0_2 = arith.constant 0 : index
    %1 = vector.load %arg2[%c0_1, %c0_2] : memref<16x128xf32, #tpu.memory_space<vmem>>, vector<16x128xf32>
    %cst = arith.constant dense<0.000000e+00> : vector<8x128xf32>
    %2 = tpu.matmul %0, %1, %cst {dimension_numbers = #tpu.dot_dimension_numbers<[1], [0], [0], [1], [0, 0, 1, 1], [], []>} : vector<8x16xf32>, vector<16x128xf32>, vector<8x128xf32> -> vector<8x128xf32>
    %c0_3 = arith.constant 0 : index
    %c0_4 = arith.constant 0 : index
    %3 = vector.load %arg3[%c0_3, %c0_4] : memref<1x128xf32, #tpu.memory_space<vmem>>, vector<1x128xf32>
    %4 = vector.broadcast %3 : vector<1x128xf32> to vector<8x128xf32>
    %5 = arith.addf %2, %4 : vector<8x128xf32>
    %cst_5 = arith.constant 0.000000e+00 : f32
    %6 = vector.broadcast %cst_5 : f32 to vector<8x128xf32>
    %7 = arith.maximumf %5, %6 : vector<8x128xf32>
    %c0_6 = arith.constant 0 : index
    %c0_7 = arith.constant 0 : index
    %8 = vector.load %arg4[%c0_6, %c0_7] : memref<128x128xf32, #tpu.memory_space<vmem>>, vector<128x128xf32>
    %cst_8 = arith.constant dense<0.000000e+00> : vector<8x128xf32>
    %9 = tpu.matmul %7, %8, %cst_8 {dimension_numbers = #tpu.dot_dimension_numbers<[1], [0], [0], [1], [0, 0, 1, 1], [], []>} : vector<8x128xf32>, vector<128x128xf32>, vector<8x128xf32> -> vector<8x128xf32>
    %c0_9 = arith.constant 0 : index
    %c0_10 = arith.constant 0 : index
    %10 = vector.load %arg5[%c0_9, %c0_10] : memref<1x128xf32, #tpu.memory_space<vmem>>, vector<1x128xf32>
    %11 = vector.broadcast %10 : vector<1x128xf32> to vector<8x128xf32>
    %12 = arith.addf %9, %11 : vector<8x128xf32>
    %cst_11 = arith.constant 0.000000e+00 : f32
    %13 = vector.broadcast %cst_11 : f32 to vector<8x128xf32>
    %14 = arith.maximumf %12, %13 : vector<8x128xf32>
    %c0_12 = arith.constant 0 : index
    %c0_13 = arith.constant 0 : index
    %15 = vector.load %arg6[%c0_12, %c0_13] : memref<128x128xf32, #tpu.memory_space<vmem>>, vector<128x128xf32>
    %cst_14 = arith.constant dense<0.000000e+00> : vector<8x128xf32>
    %16 = tpu.matmul %14, %15, %cst_14 {dimension_numbers = #tpu.dot_dimension_numbers<[1], [0], [0], [1], [0, 0, 1, 1], [], []>} : vector<8x128xf32>, vector<128x128xf32>, vector<8x128xf32> -> vector<8x128xf32>
    %c0_15 = arith.constant 0 : index
    %c0_16 = arith.constant 0 : index
    %17 = vector.load %arg7[%c0_15, %c0_16] : memref<1x128xf32, #tpu.memory_space<vmem>>, vector<1x128xf32>
    %18 = vector.broadcast %17 : vector<1x128xf32> to vector<8x128xf32>
    %19 = arith.addf %16, %18 : vector<8x128xf32>
    %20 = arith.truncf %19 : vector<8x128xf32> to vector<8x128xbf16>
    %c0_17 = arith.constant 0 : index
    %c0_18 = arith.constant 0 : index
    %21 = vector.load %arg8[%c0_17, %c0_18] : memref<8x128xbf16, #tpu.memory_space<vmem>>, vector<8x128xbf16>
    tpu.vector_store %arg8[%c0_17, %c0_18], %20 {strides = array<i32>} : memref<8x128xbf16, #tpu.memory_space<vmem>>, vector<8x128xbf16>,
    return
  }
  func.func @transform_0(%arg0: i32) -> (i32, i32) {
    %c0_i32 = arith.constant 0 : i32
    %c0_i32_0 = arith.constant 0 : i32
    return %arg0, %c0_i32 : i32, i32
  }
  func.func @transform_1(%arg0: i32) -> (i32, i32) {
    %c0_i32 = arith.constant 0 : i32
    %c0_i32_0 = arith.constant 0 : i32
    %c0_i32_1 = arith.constant 0 : i32
    return %c0_i32, %c0_i32_0 : i32, i32
  }
  func.func @transform_2(%arg0: i32) -> (i32, i32) {
    %c0_i32 = arith.constant 0 : i32
    %c0_i32_0 = arith.constant 0 : i32
    %c0_i32_1 = arith.constant 0 : i32
    return %c0_i32, %c0_i32_0 : i32, i32
  }
  func.func @transform_3(%arg0: i32) -> (i32, i32) {
    %c0_i32 = arith.constant 0 : i32
    %c0_i32_0 = arith.constant 0 : i32
    %c0_i32_1 = arith.constant 0 : i32
    return %c0_i32, %c0_i32_0 : i32, i32
  }
  func.func @transform_4(%arg0: i32) -> (i32, i32) {
    %c0_i32 = arith.constant 0 : i32
    %c0_i32_0 = arith.constant 0 : i32
    %c0_i32_1 = arith.constant 0 : i32
    return %c0_i32, %c0_i32_0 : i32, i32
  }
  func.func @transform_5(%arg0: i32) -> (i32, i32) {
    %c0_i32 = arith.constant 0 : i32
    %c0_i32_0 = arith.constant 0 : i32
    %c0_i32_1 = arith.constant 0 : i32
    return %c0_i32, %c0_i32_0 : i32, i32
  }
  func.func @transform_6(%arg0: i32) -> (i32, i32) {
    %c0_i32 = arith.constant 0 : i32
    %c0_i32_0 = arith.constant 0 : i32
    %c0_i32_1 = arith.constant 0 : i32
    return %c0_i32, %c0_i32_0 : i32, i32
  }
  func.func @transform_7(%arg0: i32) -> (i32, i32) {
    %c0_i32 = arith.constant 0 : i32
    %c0_i32_0 = arith.constant 0 : i32
    return %arg0, %c0_i32 : i32, i32
  }
}

</mosaic_0001>

<bundles_post_ra>
// kernel: tpu_custom_call.1
= control target key start
LH: loop header
LB: loop body
LE: loop exit
PB: predicated region body
PF: predicated region fallthrough
CT: control target
= control target key end

     0   :  { %12 = vsyncpa [#allocation3], 0  ;;  %s816_s0 = inlined_call_operand.hbm [shape: f32[8,16], index: 0, kind: input, shape index: {}]   ;;  %s817_s1 = inlined_call_operand.hbm [shape: f32[16,128], index: 1, kind: input, shape index: {}]   ;;  %s818_s2 = inlined_call_operand.vmem [shape: f32[1,128], index: 2, kind: input, shape index: {}]   ;;  %s819_s3 = inlined_call_operand.hbm [shape: f32[128,128], index: 3, kind: input, shape index: {}]   ;;  %s820_s4 = inlined_call_operand.vmem [shape: f32[1,128], index: 4, kind: input, shape index: {}]   ;;  %s821_s5 = inlined_call_operand.hbm [shape: f32[128,128], index: 5, kind: input, shape index: {}]   ;;  %s822_s6 = inlined_call_operand.vmem [shape: f32[1,128], index: 6, kind: input, shape index: {}]   ;;  %s823_s7 = inlined_call_operand.hbm [shape: bf16[8,128], index: 7, kind: output, shape index: {}]  }
   0x1   :  { %13 = vsyncpa [#allocation6], 0 }
   0x2   :  { %14 = vsyncpa [#allocation9], 0 }
   0x3   :  { %15 = vsyncpa [#allocation4], 0  ;;  %s668_s24 = smov [#allocation5]   ;;  %s550_s28 = scalar_lea.hbm %s817_s1, 256 }
   0x4   :  { %s31_s25 = sshll.u32 %s668_s24, 4  ;;  %p551_p0 = scmp.ne.s32.totalorder %s817_s1, %s550_s28  ;;  %s32_s25 = int_to_ptr.vmem [resolvable:$true] %s31_s25 }
   0x5   :  { %p554_p1 = scmp.lt.u32.totalorder %s550_s28, %s817_s1 }
   0x7   :  { %p556_p2 = pnand %p554_p1, %p551_p0 }
   0x9   :  { %559 = shalt.err (!%p556_p2)
}
   0xa   :  { %s560_s10 = scalar_lea.vmem %s32_s25, 256  ;;  %p565_p4 = scmp.lt.s32.totalorder %s32_s25, %s32_s25 }
   0xb   :  { %p561_p3 = scmp.ne.s32.totalorder %s32_s25, %s560_s10  ;;  %p566_p5 = scmp.lt.s32.totalorder %s560_s10, %s560_s10 }
   0xd   :  { %p567_p6 = por %p566_p5, %p565_p4 }
   0xf   :  { %p568_p7 = pnand %p567_p6, %p561_p3 }
  0x11   :  { %571 = shalt.err (!%p568_p7)
}
  0x12   :  { %s669_s11 = smov 128   ;;  %s670_s12 = smov 8  }
  0x13   :  { %37 = dma.hbm_to_vmem [thread:$0]  %s817_s1, 256, %s32_s25, [#allocation6], %s669_s11, %s669_s11, %s670_s12  }
  0x14   :  { %s671_s15 = smov [#allocation2]   ;;  %s672_s17 = smov [#allocation7]  }
  0x15   :  { %s22_s16 = sshll.u32 %s671_s15, 4  ;;  %s45_s18 = sshll.u32 %s672_s17, 4  ;;  %s23_s16 = int_to_ptr.vmem [resolvable:$true] %s22_s16  ;;  %s46_s18 = int_to_ptr.vmem [resolvable:$true] %s45_s18 }
  0x16   :  { %s572_s21 = scalar_lea.hbm %s816_s0, 128 }
  0x17   :  { %p573_p8 = scmp.ne.s32.totalorder %s816_s0, %s572_s21  ;;  %p576_p9 = scmp.lt.u32.totalorder %s572_s21, %s816_s0 }
  0x19   :  { %p578_p10 = pnand %p576_p9, %p573_p8 }
  0x1b   :  { %581 = shalt.err (!%p578_p10)
}
  0x1c   :  { %s582_s1 = scalar_lea.vmem %s23_s16, 128  ;;  %p587_p12 = scmp.lt.s32.totalorder %s23_s16, %s23_s16 }
  0x1d   :  { %p583_p11 = scmp.ne.s32.totalorder %s23_s16, %s582_s1  ;;  %p588_p13 = scmp.lt.s32.totalorder %s582_s1, %s582_s1 }
  0x1f   :  { %p589_p0 = por %p588_p13, %p587_p12 }
  0x21   :  { %p590_p1 = pnand %p589_p0, %p583_p11 }
  0x23   :  { %593 = shalt.err (!%p590_p1)
}
  0x24   :  { %25 = dma.hbm_to_vmem [thread:$0]  %s816_s0, 128, %s23_s16, [#allocation3]  }
  0x25   :  { %s594_s30 = scalar_lea.hbm %s819_s3, 2048 }
  0x26   :  { %p595_p2 = scmp.ne.s32.totalorder %s819_s3, %s594_s30  ;;  %p598_p3 = scmp.lt.u32.totalorder %s594_s30, %s819_s3 }
  0x28   :  { %p600_p4 = pnand %p598_p3, %p595_p2 }
  0x2a   :  { %603 = shalt.err (!%p600_p4)
}
  0x2b   :  { %s604_s14 = scalar_lea.vmem %s46_s18, 2048  ;;  %p609_p6 = scmp.lt.s32.totalorder %s46_s18, %s46_s18 }
  0x2c   :  { %p605_p5 = scmp.ne.s32.totalorder %s46_s18, %s604_s14  ;;  %p610_p7 = scmp.lt.s32.totalorder %s604_s14, %s604_s14 }
  0x2e   :  { %p611_p8 = por %p610_p7, %p609_p6 }
  0x30   :  { %p612_p9 = pnand %p611_p8, %p605_p5 }
  0x32   :  { %615 = shalt.err (!%p612_p9)
}
  0x33   :  { %51 = dma.hbm_to_vmem [thread:$0]  %s819_s3, 2048, %s46_s18, [#allocation6], %s669_s11, %s669_s11, %s670_s12  }
  0x34   :  { %s673_s16 = smov [#allocation8]   ;;  %s616_s21 = scalar_lea.hbm %s821_s5, 2048 }
  0x35   :  { %s59_s17 = sshll.u32 %s673_s16, 4  ;;  %p617_p10 = scmp.ne.s32.totalorder %s821_s5, %s616_s21  ;;  %s60_s17 = int_to_ptr.vmem [resolvable:$true] %s59_s17 }
  0x36   :  { %p620_p11 = scmp.lt.u32.totalorder %s616_s21, %s821_s5 }
  0x38   :  { %p622_p12 = pnand %p620_p11, %p617_p10 }
  0x3a   :  { %625 = shalt.err (!%p622_p12)
}
  0x3b   :  { %s626_s1 = scalar_lea.vmem %s60_s17, 2048  ;;  %p631_p0 = scmp.lt.s32.totalorder %s60_s17, %s60_s17 }
  0x3c   :  { %p627_p13 = scmp.ne.s32.totalorder %s60_s17, %s626_s1  ;;  %p632_p1 = scmp.lt.s32.totalorder %s626_s1, %s626_s1 }
  0x3e   :  { %p633_p2 = por %p632_p1, %p631_p0 }
  0x40   :  { %p634_p3 = pnand %p633_p2, %p627_p13 }
  0x42   :  { %637 = shalt.err (!%p634_p3)
}
  0x43   :  { %65 = dma.hbm_to_vmem [thread:$0]  %s821_s5, 2048, %s60_s17, [#allocation9], %s669_s11, %s669_s11, %s670_s12  }
  0x44   :  { %660 = dma.done.wait [#allocation3], 128  }
  0x45   :  { %661 = vsyncadd [#allocation3], 4294967168 }
  0x46   :  { %662 = dma.done.wait [#allocation6], 2304  }
  0x47   :  { %663 = vsyncadd [#allocation6], 4294964992 }
  0x48   :  { %664 = dma.done.wait [#allocation9], 2048  }
  0x49   :  { %665 = vsyncadd [#allocation9], 4294965248  ;;  %v674_v0 = vmov 0.0|0.0   ;;  %vm675_vm0 = vmmov 0   ;;  %v676_v1 = vmov 0.0   ;;  %v81_v2 = vld [vmem:[#allocation5] sm:$0xff] }
  0x4a   :  { %489 = vmatprep.subr.bf16.mxu0 %v674_v0  ;;  %416 = vmatprep.mubr.msk.f32.mxu0 %vm675_vm0, %v676_v1  ;;  %v82_v3 = vld [vmem:[#allocation5 + $0x8] sm:$0xff]  ;;  %v165_v5 = vld [vmem:[#allocation7] sm:$0xff]  ;;  %v166_v6 = vld [vmem:[#allocation7 + $0x8] sm:$0xff]  ;;  %vm90_vm1 = vcmask 130048   ;;  %s677_s28 = smov [#allocation10]  }
  0x4b   :  { %492 = vmatprep.subr.bf16.mxu1 %v674_v0  ;;  %451 = vmatprep.mubr.msk.f32.mxu1 %vm675_vm0, %v676_v1  ;;  %v490_v4 = vpack.c.bf16 %v82_v3, %v81_v2  ;;  %v167_v7 = vld [vmem:[#allocation7 + $0x10] sm:$0xff]  ;;  %v493_v8 = vpack.c.bf16 %v166_v6, %v165_v5  ;;  %v168_v9 = vld [vmem:[#allocation7 + $0x18] sm:$0xff]  ;;  %v80_v10 = vld [vmem:[#allocation2] sm:$0xff]  ;;  %s360_s29 = sshll.u32 %s677_s28, 4  ;;  %s361_s29 = int_to_ptr.vmem [resolvable:$true] %s360_s29 }
  0x4c   :  { %v496_v11 = vpack.c.bf16 %v168_v9, %v167_v7  ;;  %v169_v12 = vld [vmem:[#allocation7 + $0x20] sm:$0xff]  ;;  %v170_v13 = vld [vmem:[#allocation7 + $0x28] sm:$0xff]  ;;  %v171_v15 = vld [vmem:[#allocation7 + $0x30] sm:$0xff]  ;;  %s638_s30 = scalar_lea.vmem %s361_s29, 64  ;;  %p643_p5 = scmp.lt.s32.totalorder %s361_s29, %s361_s29 }
  0x4d   :  { %491 = vmatpush3.bf16.msra.mxu0 %v490_v4  ;;  %494 = vmatpush3.bf16.msra.mxu1 %v493_v8  ;;  %v499_v14 = vpack.c.bf16 %v170_v13, %v169_v12  ;;  %v172_v16 = vld [vmem:[#allocation7 + $0x38] sm:$0xff]  ;;  %v173_v18 = vld [vmem:[#allocation7 + $0x40] sm:$0xff]  ;;  %v174_v19 = vld [vmem:[#allocation7 + $0x48] sm:$0xff]  ;;  %p639_p4 = scmp.ne.s32.totalorder %s361_s29, %s638_s30  ;;  %p644_p6 = scmp.lt.s32.totalorder %s638_s30, %s638_s30 }
  0x4e   :  { %516 = vmatprep.subr.bf16.mxu0 %v674_v0  ;;  %495 = vmatprep.subr.bf16.mxu1 %v674_v0  ;;  %v502_v17 = vpack.c.bf16 %v172_v16, %v171_v15  ;;  %v505_v20 = vpack.c.bf16 %v174_v19, %v173_v18  ;;  %v175_v21 = vld [vmem:[#allocation7 + $0x50] sm:$0xff]  ;;  %v176_v22 = vld [vmem:[#allocation7 + $0x58] sm:$0xff]  ;;  %v177_v24 = vld [vmem:[#allocation7 + $0x60] sm:$0xff] }
  0x4f   :  { %v508_v23 = vpack.c.bf16 %v176_v22, %v175_v21  ;;  %v178_v25 = vld [vmem:[#allocation7 + $0x68] sm:$0xff]  ;;  %v179_v27 = vld [vmem:[#allocation7 + $0x70] sm:$0xff]  ;;  %v180_v28 = vld [vmem:[#allocation7 + $0x78] sm:$0xff]  ;;  %p645_p7 = por %p644_p6, %p643_p5 }
  0x50   :  { %417 = vmatmul.mubr.msk.f32.vlgmr.msra.gmra.mrb[0].mxu0 %vm90_vm1, %v80_v10  ;;  %v511_v26 = vpack.c.bf16 %v178_v25, %v177_v24  ;;  %v514_v29 = vpack.c.bf16 %v180_v28, %v179_v27  ;;  %v259_v30 = vld [vmem:[#allocation8] sm:$0xff]  ;;  %v260_v31 = vld [vmem:[#allocation8 + $0x8] sm:$0xff]  ;;  %v261_v32 = vld [vmem:[#allocation8 + $0x10] sm:$0xff] }
  0x51   :  { %486 = vmatprep.mubr.msk.f32.mxu0 %vm675_vm0, %v676_v1  ;;  %497 = vmatpush3.bf16.msra.mxu1 %v496_v11  ;;  %v517_v33 = vpack.c.bf16 %v260_v31, %v259_v30  ;;  %v262_v34 = vld [vmem:[#allocation8 + $0x18] sm:$0xff]  ;;  %v263_v36 = vld [vmem:[#allocation8 + $0x20] sm:$0xff]  ;;  %v264_v37 = vld [vmem:[#allocation8 + $0x28] sm:$0xff]  ;;  %p646_p8 = pnand %p645_p7, %p639_p4 }
  0x52   :  { %498 = vmatprep.subr.bf16.mxu1 %v674_v0  ;;  %v520_v35 = vpack.c.bf16 %v262_v34, %v261_v32  ;;  %v523_v38 = vpack.c.bf16 %v264_v37, %v263_v36  ;;  %v265_v39 = vld [vmem:[#allocation8 + $0x30] sm:$0xff]  ;;  %v266_v40 = vld [vmem:[#allocation8 + $0x38] sm:$0xff]  ;;  %v267_v42 = vld [vmem:[#allocation8 + $0x40] sm:$0xff] }
  0x53   :  { %518 = vmatpush3.bf16.msra.mxu0 %v517_v33  ;;  %v526_v41 = vpack.c.bf16 %v266_v40, %v265_v39  ;;  %v268_v43 = vld [vmem:[#allocation8 + $0x48] sm:$0xff]  ;;  %v269_v45 = vld [vmem:[#allocation8 + $0x50] sm:$0xff]  ;;  %v270_v46 = vld [vmem:[#allocation8 + $0x58] sm:$0xff] }
  0x54   :  { %519 = vmatprep.subr.bf16.mxu0 %v674_v0  ;;  %v529_v44 = vpack.c.bf16 %v268_v43, %v267_v42  ;;  %v532_v47 = vpack.c.bf16 %v270_v46, %v269_v45  ;;  %v271_v48 = vld [vmem:[#allocation8 + $0x60] sm:$0xff]  ;;  %v272_v49 = vld [vmem:[#allocation8 + $0x68] sm:$0xff]  ;;  %v273_v56 = vld [vmem:[#allocation8 + $0x70] sm:$0xff] }
  0x55   :  { %500 = vmatpush3.bf16.msra.mxu1 %v499_v14  ;;  %v535_v50 = vpack.c.bf16 %v272_v49, %v271_v48  ;;  %v371_v51 = vld [vmem:[%s818_s2] ss:$0 sm:$0xff]  ;;  %v274_v57 = vld [vmem:[#allocation8 + $0x78] sm:$0xff] }
  0x56   :  { %501 = vmatprep.subr.bf16.mxu1 %v674_v0  ;;  %v538_v58 = vpack.c.bf16 %v274_v57, %v273_v56  ;;  %v373_v59 = vld [vmem:[%s820_s4] ss:$0 sm:$0xff] }
  0x57   :  { %521 = vmatpush3.bf16.msra.mxu0 %v520_v35 }
  0x58   :  { %522 = vmatprep.subr.bf16.mxu0 %v674_v0 }
  0x59   :  { %503 = vmatpush3.bf16.msra.mxu1 %v502_v17 }
  0x5a   :  { %504 = vmatprep.subr.bf16.mxu1 %v674_v0 }
  0x5b   :  { %524 = vmatpush3.bf16.msra.mxu0 %v523_v38 }
  0x5c   :  { %525 = vmatprep.subr.bf16.mxu0 %v674_v0 }
  0x5d   :  { %506 = vmatpush3.bf16.msra.mxu1 %v505_v20 }
  0x5e   :  { %507 = vmatprep.subr.bf16.mxu1 %v674_v0 }
  0x5f   :  { %527 = vmatpush3.bf16.msra.mxu0 %v526_v41 }
  0x60   :  { %528 = vmatprep.subr.bf16.mxu0 %v674_v0 }
  0x61   :  { %509 = vmatpush3.bf16.msra.mxu1 %v508_v23 }
  0x62   :  { %510 = vmatprep.subr.bf16.mxu1 %v674_v0 }
  0x63   :  { %530 = vmatpush3.bf16.msra.mxu0 %v529_v44 }
  0x64   :  { %531 = vmatprep.subr.bf16.mxu0 %v674_v0 }
  0x65   :  { %512 = vmatpush3.bf16.msra.mxu1 %v511_v26 }
  0x66   :  { %513 = vmatprep.subr.bf16.mxu1 %v674_v0 }
  0x67   :  { %533 = vmatpush3.bf16.msra.mxu0 %v532_v47 }
  0x68   :  { %534 = vmatprep.subr.bf16.mxu0 %v674_v0 }
  0x69   :  { %515 = vmatpush3.bf16.msra.mxu1 %v514_v29 }
  0x6b   :  { %536 = vmatpush3.bf16.msra.mxu0 %v535_v50 }
  0x6c   :  { %537 = vmatprep.subr.bf16.mxu0 %v674_v0  ;;  %v374_v0 = vld [vmem:[%s822_s6] ss:$0 sm:$0xff] }
  0x6f   :  { %539 = vmatpush3.bf16.msra.mxu0 %v538_v58 }
 0x123   :  { %v160_v52 = vpop.f32.mrb[0].mxu0 }
 0x124   :  { %v161_v53 = vadd.f32 %v371_v51, %v160_v52  ;;  %v418_v54 = vpop.f32.mrb[1].mxu0 }
 0x126   :  { %v164_v55 = vmax.f32 %v161_v53, 0.0 }
 0x128   :  { %452 = vmatmul.mubr.f32.vlgmr.msra.gmra.mrb[0].mxu1 %v164_v55 }
 0x1fb   :  { %v254_v60 = vpop.f32.mrb[0].mxu1 }
 0x1fc   :  { %v255_v61 = vadd.f32 %v373_v59, %v254_v60  ;;  %v453_v62 = vpop.f32.mrb[1].mxu1 }
 0x1fe   :  { %v258_v63 = vmax.f32 %v255_v61, 0.0 }
 0x200   :  { %487 = vmatmul.mubr.f32.vlgmr.msra.gmra.mrb[2].mxu0 %v258_v63 }
 0x2d3   :  { %v348_v1 = vpop.f32.mrb[2].mxu0 }
 0x2d4   :  { %v349_v2 = vadd.f32 %v374_v0, %v348_v1  ;;  %v488_v3 = vpop.f32.mrb[3].mxu0 }
 0x2d6   :  { %v352_v4 = vpack.c.bf16 %v349_v2, %v349_v2 }
 0x2d8   :  { %353 = vst [vmem:[#allocation10] sm:$0xf] %v352_v4 }
 0x2d9   :  { %649 = shalt.err (!%p646_p8)
}
 0x2da   :  { %s650_s9 = scalar_lea.hbm %s823_s7, 64 }
 0x2db   :  { %p651_p9 = scmp.ne.s32.totalorder %s823_s7, %s650_s9  ;;  %p654_p10 = scmp.lt.u32.totalorder %s650_s9, %s823_s7 }
 0x2dd   :  { %p656_p11 = pnand %p654_p10, %p651_p9 }
 0x2df   :  { %659 = shalt.err (!%p656_p11)
}
 0x2e0   :  { %363 = dma.vmem_to_hbm [thread:$0]  %s361_s29, 64, %s823_s7, [#allocation4]  }
 0x2e1   :  { %666 = dma.done.wait [#allocation4], 64  }
 0x2e2   :  { %667 = vsyncadd [#allocation4], 4294967232 }
 0x2e3   :  { %367 = vsyncpa [#allocation3], 1 }
 0x2e4   :  { %368 = vsyncpa [#allocation6], 1 }
 0x2e5   :  { %369 = vsyncpa [#allocation9], 1 }
 0x2e6   :  { %370 = vsyncpa [#allocation4], 1 }

</bundles_post_ra>
